<compile_context>
chip_gen: v7x
topology: tpu7x:2x2x1
jax: 0.10.0
libtpu: 0.0.40
codegen_flags: <defaults>
</compile_context>

<pallas_src>
import math
import functools

import jax
import jax.numpy as jnp
from jax import lax
from jax.experimental import pallas as pl
from jax.experimental.pallas import tpu as pltpu


# ---------------------------------------------------------------------------
# Fused kernel: projections + attention + output projection for one (batch, q-block)
# ---------------------------------------------------------------------------
def _fused_rci_kernel(q_ref, k_ref, v_ref,
                      w_qk_ref, b_qk_ref, w_v_ref, b_v_ref, w_o_ref, b_o_ref,
                      o_ref, kp_ref, vp_ref, *, n_heads, d_k):
    f32 = jnp.float32
    bf16 = jnp.bfloat16

    w_qk = w_qk_ref[...].astype(bf16)

    # ---- K/V projections: once per batch element, cached in VMEM scratch -----------
    # grid = (batch, q_blocks) with q as the inner "arbitrary" axis, so q-block 0 of a
    # batch element always runs before its other q-blocks on the same core and the
    # cached kp/vp stay valid for them (no per-q-block recompute).
    @pl.when(pl.program_id(1) == 0)
    def _project_kv():
        k = k_ref[0].astype(bf16)                                  # [S, D]
        v = v_ref[0].astype(bf16)                                  # [S, D]
        w_v = w_v_ref[...].astype(bf16)
        kp = jnp.dot(k, w_qk, preferred_element_type=f32) + b_qk_ref[...]
        vp = jnp.dot(v, w_v, preferred_element_type=f32) + b_v_ref[...]
        kp_ref[...] = kp.astype(bf16)        # bf16 cache: ready-to-use MXU operand
        vp_ref[...] = vp.astype(bf16)

    # ---- Q projection for this q-block (1/sqrt(d_k) folded into Q) -----------------
    scale = 1.0 / math.sqrt(d_k)
    q = q_ref[0].astype(bf16)                                      # [block_q, D]
    qp = (jnp.dot(q, w_qk, preferred_element_type=f32) + b_qk_ref[...]) * scale
    qp = qp.astype(bf16)

    kp = kp_ref[...]                                               # [S, D] bf16
    vp = vp_ref[...]                                               # [S, D] bf16

    # ---- per-head attention; normalization deferred to the small context tile ------
    ctx_parts = []
    for h in range(n_heads):   # static unroll; see TODOs on live ranges / d_k < 128
        sl = slice(h * d_k, (h + 1) * d_k)
        qh, kh, vh = qp[:, sl], kp[:, sl], vp[:, sl]
        # scores = qh @ kh^T  (Q already carries the 1/sqrt(d_k) scale)
        s = lax.dot_general(qh, kh, (((1,), (1,)), ((), ())),
                            preferred_element_type=f32)           # [block_q, S]
        # TODO(synk): mask != None path (masked_fill with -1e9) not implemented.
        m = jnp.max(s, axis=-1, keepdims=True)
        p = jnp.exp(s - m)
        denom = jnp.sum(p, axis=-1, keepdims=True)
        # Unnormalized P@V in bf16, then scale the [block_q, d_k] context instead of
        # the [block_q, S] probability tile (~S/d_k fewer VPU multiplies per head).
        ctx_h = jnp.dot(p.astype(bf16), vh, preferred_element_type=f32)
        ctx_parts.append(ctx_h * pl.reciprocal(denom, approx=True))
        # dropout: inference no-op.

    # ---- head merge folded into ONE full-contraction output projection -------------
    ctx = jnp.concatenate(ctx_parts, axis=-1).astype(bf16)         # [block_q, D]
    w_o = w_o_ref[...].astype(bf16)
    out = jnp.dot(ctx, w_o, preferred_element_type=f32) + b_o_ref[...]
    o_ref[0] = out.astype(o_ref.dtype)


# ---------------------------------------------------------------------------
# Wrapper
# ---------------------------------------------------------------------------
def rci_attention_forward(params, q, k, v, *, block_q=None, vmem_limit_bytes=None,
                          single_buffer_invariants=False):
    """Fused RCIAttention forward. q, k, v: [B, S, D] -> [B, S, D]."""
    B, S, D = q.shape
    H = int(params["n_heads"])
    d_k = D // H
    assert H * d_k == D

    # 256 matches the v6e/v7x 256x256 MXU tile (use 128 on v5e).  Ragged S is handled
    # by zero-padding the padded q rows (softmax is per-row, so K/V keep the true S and
    # the extra output rows are sliced off) — never by collapsing to a full-S q tile.
    if block_q is None:
        block_q = 256
    block_q = max(1, min(block_q, S))
    num_q = int(pl.cdiv(S, block_q))
    S_pad = num_q * block_q
    q_in = q if S_pad == S else jnp.pad(q, ((0, 0), (0, S_pad - S), (0, 0)))

    kernel = functools.partial(_fused_rci_kernel, n_heads=H, d_k=d_k)

    itemsize = int(q.dtype.itemsize)

    # Actual executed work (K/V projections run once per batch element, not per q-block).
    flops = int(4 * (2 * B * S * D * D) + 2 * (2 * B * H * S_pad * S * d_k))
    transcendentals = int(B * H * S_pad * S)
    bytes_accessed = int((4 * B * S * D + 3 * D * D + 3 * D) * itemsize)

    # VMEM working set: streamed Q/O tiles (double-buffered), resident K/V + weights,
    # bf16 kp/vp cache, f32 score/exp and qp/ctx intermediates.
    resident_mult = 1 if single_buffer_invariants else 2
    need = (2 * block_q * D * itemsize                       # Q tiles
            + 2 * block_q * D * itemsize                     # O tiles
            + resident_mult * (2 * S * D * itemsize          # K, V resident tiles
                               + (3 * D * D + 3 * D) * itemsize)   # weights/biases
            + 2 * S * D * 2                                  # kp/vp bf16 scratch
            + 4 * block_q * S * 4                            # score/exp intermediates
            + 4 * block_q * D * 4)                           # qp/ctx intermediates
    if vmem_limit_bytes is None:
        vmem_limit_bytes = min(max(int(1.5 * need), 32 * 1024 * 1024),
                               100 * 1024 * 1024)

    # Grid-invariant inputs gain nothing from double-buffering; on v7x (64 MiB VMEM)
    # single-buffer them to halve their resident footprint.
    inv_kwargs = dict(pipeline_mode=pl.Buffered(1)) if single_buffer_invariants else {}

    grid_spec = pltpu.PrefetchScalarGridSpec(
        num_scalar_prefetch=0,
        grid=(B, num_q),
        in_specs=[
            # Q tiles stream over the q-block axis.
            pl.BlockSpec((1, block_q, D), lambda b, i: (b, i, 0)),
            # K/V: full sequence of the batch element; constant index along the q axis
            # -> stays VMEM-resident across q-blocks (no re-DMA).
            pl.BlockSpec((1, S, D), lambda b, i: (b, 0, 0), **inv_kwargs),
            pl.BlockSpec((1, S, D), lambda b, i: (b, 0, 0), **inv_kwargs),
            # Weights / biases: constant index -> VMEM-resident for the whole grid.
            pl.BlockSpec((D, D), lambda b, i: (0, 0), **inv_kwargs),   # w_qk (shared Q/K)
            pl.BlockSpec((1, D), lambda b, i: (0, 0), **inv_kwargs),   # b_qk
            pl.BlockSpec((D, D), lambda b, i: (0, 0), **inv_kwargs),   # w_v
            pl.BlockSpec((1, D), lambda b, i: (0, 0), **inv_kwargs),   # b_v
            pl.BlockSpec((D, D), lambda b, i: (0, 0), **inv_kwargs),   # w_o
            pl.BlockSpec((1, D), lambda b, i: (0, 0), **inv_kwargs),   # b_o
        ],
        out_specs=pl.BlockSpec((1, block_q, D), lambda b, i: (b, i, 0)),
        scratch_shapes=[
            pltpu.VMEM((S, D), jnp.bfloat16),   # cached K projection (per batch element)
            pltpu.VMEM((S, D), jnp.bfloat16),   # cached V projection (per batch element)
        ],
    )

    out = pl.pallas_call(
        kernel,
        out_shape=jax.ShapeDtypeStruct((B, S_pad, D), q.dtype),
        grid_spec=grid_spec,
        compiler_params=pltpu.CompilerParams(
            # batch: megacore-parallel (v7x TC sharding); q: "arbitrary" so the kp/vp
            # scratch written at q-block 0 is guaranteed valid for the later q-blocks.
            dimension_semantics=("parallel", "arbitrary"),
            vmem_limit_bytes=int(vmem_limit_bytes),
        ),
        cost_estimate=pl.CostEstimate(
            flops=flops,
            transcendentals=transcendentals,
            bytes_accessed=bytes_accessed,
        ),
    )(q_in, k, v,
      params["w_qk"], params["b_qk"],
      params["w_v"], params["b_v"],
      params["w_o"], params["b_o"])

    return out if S_pad == S else out[:, :S, :]


# ---------------------------------------------------------------------------
# Pure-JAX reference (for correctness check)
# ---------------------------------------------------------------------------
def rci_attention_reference(params, q, k, v):
    B, S, D = q.shape
    H = int(params["n_heads"])
    d_k = D // H

    def lin(x, w, b):
        return x @ w + b[0]

    def heads(x):
        return x.reshape(B, S, H, d_k).transpose(0, 2, 1, 3)

    qh = heads(lin(q, params["w_qk"], params["b_qk"]))
    kh = heads(lin(k, params["w_qk"], params["b_qk"]))
    vh = heads(lin(v, params["w_v"], params["b_v"]))

    scores = jnp.einsum('bhqd,bhkd->bhqk', qh, kh) / math.sqrt(d_k)
    attn = jax.nn.softmax(scores, axis=-1)
    ctx = jnp.einsum('bhqk,bhkd->bhqd', attn, vh)
    ctx = ctx.transpose(0, 2, 1, 3).reshape(B, S, D)
    return lin(ctx, params["w_o"], params["b_o"])


# ---------------------------------------------------------------------------
# Main
# ---------------------------------------------------------------------------
if __name__ == "__main__":
    B, S, D, H = 2, 16, 32, 4          # batch, seq, d_model, n_heads
    dtype = jnp.float32

    key = jax.random.PRNGKey(0)
    keys = jax.random.split(key, 9)

    # PyTorch Linear stores [out, in]; we keep the transposed [in, out] form so the
    # kernel computes x @ W + b directly.
    bound = 1.0 / math.sqrt(D)
    params = {
        "n_heads": H,
        "w_qk": jax.random.uniform(keys[0], (D, D), dtype, -bound, bound),
        "b_qk": jax.random.uniform(keys[1], (1, D), dtype, -bound, bound),
        "w_v":  jax.random.uniform(keys[2], (D, D), dtype, -bound, bound),
        "b_v":  jax.random.uniform(keys[3], (1, D), dtype, -bound, bound),
        "w_o":  jax.random.uniform(keys[4], (D, D), dtype, -bound, bound),
        "b_o":  jax.random.uniform(keys[5], (1, D), dtype, -bound, bound),
    }

    q = jax.random.normal(keys[6], (B, S, D), dtype)
    k = jax.random.normal(keys[7], (B, S, D), dtype)
    v = jax.random.normal(keys[8], (B, S, D), dtype)

    # block_q=8 -> 2 q-blocks per batch element, exercising the cross-q-block reuse of
    # the cached K/V projections.
    out = jax.block_until_ready(rci_attention_forward(params, q, k, v, block_q=8))
    ref = rci_attention_reference(params, q, k, v)

    assert out.shape == (B, S, D), out.shape
    max_err = float(jnp.max(jnp.abs(out - ref)))
    # Tolerance accounts for bf16 MXU operands (f32 accumulation) and the approximate
    # (EUP) reciprocal used on the deferred softmax normalization.
    assert jnp.allclose(out, ref, atol=4e-2, rtol=4e-2), max_err

    print("KERNEL_OK")
</pallas_src>

<mosaic_0001>
module attributes {stable_mosaic.version = 11 : i64} {
  func.func @_fused_rci_kernel(%arg0: i32, %arg1: i32, %arg2: memref<1x8x32xf32, #tpu.memory_space<vmem>>, %arg3: memref<1x16x32xf32, #tpu.memory_space<vmem>>, %arg4: memref<1x16x32xf32, #tpu.memory_space<vmem>>, %arg5: memref<32x32xf32, #tpu.memory_space<vmem>>, %arg6: memref<1x32xf32, #tpu.memory_space<vmem>>, %arg7: memref<32x32xf32, #tpu.memory_space<vmem>>, %arg8: memref<1x32xf32, #tpu.memory_space<vmem>>, %arg9: memref<32x32xf32, #tpu.memory_space<vmem>>, %arg10: memref<1x32xf32, #tpu.memory_space<vmem>>, %arg11: memref<1x8x32xf32, #tpu.memory_space<vmem>>, %arg12: memref<16x32xbf16, #tpu.memory_space<vmem>>, %arg13: memref<16x32xbf16, #tpu.memory_space<vmem>>) attributes {dimension_semantics = [#tpu.dimension_semantics<parallel>, #tpu.dimension_semantics<arbitrary>], iteration_bounds = array<i64: 2, 2>, scalar_prefetch = 0 : i64, scratch_operands = 2 : i64, tpu.core_type = #tpu.core_type<tc>, window_params = [{transform_indices = @transform_0, window_bounds = array<i64: 1, 8, 32>}, {transform_indices = @transform_1, window_bounds = array<i64: 1, 16, 32>}, {transform_indices = @transform_2, window_bounds = array<i64: 1, 16, 32>}, {pipeline_mode = #tpu.pipeline_mode<synchronous>, transform_indices = @transform_3, window_bounds = array<i64: 32, 32>}, {pipeline_mode = #tpu.pipeline_mode<synchronous>, transform_indices = @transform_4, window_bounds = array<i64: 1, 32>}, {pipeline_mode = #tpu.pipeline_mode<synchronous>, transform_indices = @transform_5, window_bounds = array<i64: 32, 32>}, {pipeline_mode = #tpu.pipeline_mode<synchronous>, transform_indices = @transform_6, window_bounds = array<i64: 1, 32>}, {pipeline_mode = #tpu.pipeline_mode<synchronous>, transform_indices = @transform_7, window_bounds = array<i64: 32, 32>}, {pipeline_mode = #tpu.pipeline_mode<synchronous>, transform_indices = @transform_8, window_bounds = array<i64: 1, 32>}, {transform_indices = @transform_9, window_bounds = array<i64: 1, 8, 32>}]} {
    %c0 = arith.constant 0 : index
    %c0_0 = arith.constant 0 : index
    %0 = vector.load %arg5[%c0, %c0_0] : memref<32x32xf32, #tpu.memory_space<vmem>>, vector<32x32xf32>
    %1 = arith.truncf %0 : vector<32x32xf32> to vector<32x32xbf16>
    %c0_i32 = arith.constant 0 : i32
    %2 = arith.cmpi eq, %arg1, %c0_i32 : i32
    %3 = arith.extui %2 : i1 to i32
    %c0_i32_1 = arith.constant 0 : i32
    %4 = arith.cmpi ne, %3, %c0_i32_1 : i32
    scf.if %4 {
      %c0_36 = arith.constant 0 : index
      %c0_37 = arith.constant 0 : index
      %c0_38 = arith.constant 0 : index
      %92 = vector.load %arg3[%c0_36, %c0_37, %c0_38] : memref<1x16x32xf32, #tpu.memory_space<vmem>>, vector<1x16x32xf32>
      %93 = vector.shape_cast %92 : vector<1x16x32xf32> to vector<16x32xf32>
      %94 = arith.truncf %93 : vector<16x32xf32> to vector<16x32xbf16>
      %c0_39 = arith.constant 0 : index
      %c0_40 = arith.constant 0 : index
      %c0_41 = arith.constant 0 : index
      %95 = vector.load %arg4[%c0_39, %c0_40, %c0_41] : memref<1x16x32xf32, #tpu.memory_space<vmem>>, vector<1x16x32xf32>
      %96 = vector.shape_cast %95 : vector<1x16x32xf32> to vector<16x32xf32>
      %97 = arith.truncf %96 : vector<16x32xf32> to vector<16x32xbf16>
      %c0_42 = arith.constant 0 : index
      %c0_43 = arith.constant 0 : index
      %98 = vector.load %arg7[%c0_42, %c0_43] : memref<32x32xf32, #tpu.memory_space<vmem>>, vector<32x32xf32>
      %99 = arith.truncf %98 : vector<32x32xf32> to vector<32x32xbf16>
      %cst_44 = arith.constant dense<0.000000e+00> : vector<16x32xf32>
      %100 = tpu.matmul %94, %1, %cst_44 {dimension_numbers = #tpu.dot_dimension_numbers<[1], [0], [0], [1], [0, 0, 1, 1], [], []>} : vector<16x32xbf16>, vector<32x32xbf16>, vector<16x32xf32> -> vector<16x32xf32>
      %c0_45 = arith.constant 0 : index
      %c0_46 = arith.constant 0 : index
      %101 = vector.load %arg6[%c0_45, %c0_46] : memref<1x32xf32, #tpu.memory_space<vmem>>, vector<1x32xf32>
      %102 = vector.broadcast %101 : vector<1x32xf32> to vector<16x32xf32>
      %103 = arith.addf %100, %102 : vector<16x32xf32>
      %cst_47 = arith.constant dense<0.000000e+00> : vector<16x32xf32>
      %104 = tpu.matmul %97, %99, %cst_47 {dimension_numbers = #tpu.dot_dimension_numbers<[1], [0], [0], [1], [0, 0, 1, 1], [], []>} : vector<16x32xbf16>, vector<32x32xbf16>, vector<16x32xf32> -> vector<16x32xf32>
      %c0_48 = arith.constant 0 : index
      %c0_49 = arith.constant 0 : index
      %105 = vector.load %arg8[%c0_48, %c0_49] : memref<1x32xf32, #tpu.memory_space<vmem>>, vector<1x32xf32>
      %106 = vector.broadcast %105 : vector<1x32xf32> to vector<16x32xf32>
      %107 = arith.addf %104, %106 : vector<16x32xf32>
      %108 = arith.truncf %103 : vector<16x32xf32> to vector<16x32xbf16>
      %c0_50 = arith.constant 0 : index
      %c0_51 = arith.constant 0 : index
      %109 = vector.load %arg12[%c0_50, %c0_51] : memref<16x32xbf16, #tpu.memory_space<vmem>>, vector<16x32xbf16>
      tpu.vector_store %arg12[%c0_50, %c0_51], %108 {strides = array<i32>} : memref<16x32xbf16, #tpu.memory_space<vmem>>, vector<16x32xbf16>,
      %110 = arith.truncf %107 : vector<16x32xf32> to vector<16x32xbf16>
      %c0_52 = arith.constant 0 : index
      %c0_53 = arith.constant 0 : index
      %111 = vector.load %arg13[%c0_52, %c0_53] : memref<16x32xbf16, #tpu.memory_space<vmem>>, vector<16x32xbf16>
      tpu.vector_store %arg13[%c0_52, %c0_53], %110 {strides = array<i32>} : memref<16x32xbf16, #tpu.memory_space<vmem>>, vector<16x32xbf16>,
    } else {
    }
    %c0_2 = arith.constant 0 : index
    %c0_3 = arith.constant 0 : index
    %c0_4 = arith.constant 0 : index
    %5 = vector.load %arg2[%c0_2, %c0_3, %c0_4] : memref<1x8x32xf32, #tpu.memory_space<vmem>>, vector<1x8x32xf32>
    %6 = vector.shape_cast %5 : vector<1x8x32xf32> to vector<8x32xf32>
    %7 = arith.truncf %6 : vector<8x32xf32> to vector<8x32xbf16>
    %cst = arith.constant dense<0.000000e+00> : vector<8x32xf32>
    %8 = tpu.matmul %7, %1, %cst {dimension_numbers = #tpu.dot_dimension_numbers<[1], [0], [0], [1], [0, 0, 1, 1], [], []>} : vector<8x32xbf16>, vector<32x32xbf16>, vector<8x32xf32> -> vector<8x32xf32>
    %c0_5 = arith.constant 0 : index
    %c0_6 = arith.constant 0 : index
    %9 = vector.load %arg6[%c0_5, %c0_6] : memref<1x32xf32, #tpu.memory_space<vmem>>, vector<1x32xf32>
    %10 = vector.broadcast %9 : vector<1x32xf32> to vector<8x32xf32>
    %11 = arith.addf %8, %10 : vector<8x32xf32>
    %cst_7 = arith.constant 0.353553385 : f32
    %12 = vector.broadcast %cst_7 : f32 to vector<8x32xf32>
    %13 = arith.mulf %11, %12 : vector<8x32xf32>
    %14 = arith.truncf %13 : vector<8x32xf32> to vector<8x32xbf16>
    %c0_8 = arith.constant 0 : index
    %c0_9 = arith.constant 0 : index
    %15 = vector.load %arg12[%c0_8, %c0_9] : memref<16x32xbf16, #tpu.memory_space<vmem>>, vector<16x32xbf16>
    %c0_10 = arith.constant 0 : index
    %c0_11 = arith.constant 0 : index
    %16 = vector.load %arg13[%c0_10, %c0_11] : memref<16x32xbf16, #tpu.memory_space<vmem>>, vector<16x32xbf16>
    %17 = vector.extract_strided_slice %14 {offsets = [0, 0], sizes = [8, 8], strides = [1, 1]} : vector<8x32xbf16> to vector<8x8xbf16>
    %18 = vector.extract_strided_slice %15 {offsets = [0, 0], sizes = [16, 8], strides = [1, 1]} : vector<16x32xbf16> to vector<16x8xbf16>
    %19 = vector.extract_strided_slice %16 {offsets = [0, 0], sizes = [16, 8], strides = [1, 1]} : vector<16x32xbf16> to vector<16x8xbf16>
    %cst_12 = arith.constant dense<0.000000e+00> : vector<8x16xf32>
    %20 = tpu.matmul %17, %18, %cst_12 {dimension_numbers = #tpu.dot_dimension_numbers<[1], [1], [0], [0], [0, 0, 1, 0], [], []>} : vector<8x8xbf16>, vector<16x8xbf16>, vector<8x16xf32> -> vector<8x16xf32>
    %cst_13 = arith.constant dense<0xFF800000> : vector<8xf32>
    %21 = vector.multi_reduction <maximumf>, %20, %cst_13 [1] : vector<8x16xf32> to vector<8xf32>
    %22 = vector.shape_cast %21 : vector<8xf32> to vector<8x1xf32>
    %23 = vector.broadcast %22 : vector<8x1xf32> to vector<8x16xf32>
    %24 = arith.subf %20, %23 : vector<8x16xf32>
    %25 = math.exp %24 : vector<8x16xf32>
    %cst_14 = arith.constant dense<0.000000e+00> : vector<8xf32>
    %26 = vector.multi_reduction <add>, %25, %cst_14 [1] : vector<8x16xf32> to vector<8xf32>
    %27 = vector.shape_cast %26 : vector<8xf32> to vector<8x1xf32>
    %28 = arith.truncf %25 : vector<8x16xf32> to vector<8x16xbf16>
    %cst_15 = arith.constant dense<0.000000e+00> : vector<8x8xf32>
    %29 = tpu.matmul %28, %19, %cst_15 {dimension_numbers = #tpu.dot_dimension_numbers<[1], [0], [0], [1], [0, 0, 1, 1], [], []>} : vector<8x16xbf16>, vector<16x8xbf16>, vector<8x8xf32> -> vector<8x8xf32>
    %30 = tpu.reciprocal %27 {approx = true} : vector<8x1xf32> -> vector<8x1xf32>
    %31 = vector.broadcast %30 : vector<8x1xf32> to vector<8x8xf32>
    %32 = arith.mulf %29, %31 : vector<8x8xf32>
    %33 = vector.extract_strided_slice %14 {offsets = [0, 8], sizes = [8, 8], strides = [1, 1]} : vector<8x32xbf16> to vector<8x8xbf16>
    %34 = vector.extract_strided_slice %15 {offsets = [0, 8], sizes = [16, 8], strides = [1, 1]} : vector<16x32xbf16> to vector<16x8xbf16>
    %35 = vector.extract_strided_slice %16 {offsets = [0, 8], sizes = [16, 8], strides = [1, 1]} : vector<16x32xbf16> to vector<16x8xbf16>
    %cst_16 = arith.constant dense<0.000000e+00> : vector<8x16xf32>
    %36 = tpu.matmul %33, %34, %cst_16 {dimension_numbers = #tpu.dot_dimension_numbers<[1], [1], [0], [0], [0, 0, 1, 0], [], []>} : vector<8x8xbf16>, vector<16x8xbf16>, vector<8x16xf32> -> vector<8x16xf32>
    %cst_17 = arith.constant dense<0xFF800000> : vector<8xf32>
    %37 = vector.multi_reduction <maximumf>, %36, %cst_17 [1] : vector<8x16xf32> to vector<8xf32>
    %38 = vector.shape_cast %37 : vector<8xf32> to vector<8x1xf32>
    %39 = vector.broadcast %38 : vector<8x1xf32> to vector<8x16xf32>
    %40 = arith.subf %36, %39 : vector<8x16xf32>
    %41 = math.exp %40 : vector<8x16xf32>
    %cst_18 = arith.constant dense<0.000000e+00> : vector<8xf32>
    %42 = vector.multi_reduction <add>, %41, %cst_18 [1] : vector<8x16xf32> to vector<8xf32>
    %43 = vector.shape_cast %42 : vector<8xf32> to vector<8x1xf32>
    %44 = arith.truncf %41 : vector<8x16xf32> to vector<8x16xbf16>
    %cst_19 = arith.constant dense<0.000000e+00> : vector<8x8xf32>
    %45 = tpu.matmul %44, %35, %cst_19 {dimension_numbers = #tpu.dot_dimension_numbers<[1], [0], [0], [1], [0, 0, 1, 1], [], []>} : vector<8x16xbf16>, vector<16x8xbf16>, vector<8x8xf32> -> vector<8x8xf32>
    %46 = tpu.reciprocal %43 {approx = true} : vector<8x1xf32> -> vector<8x1xf32>
    %47 = vector.broadcast %46 : vector<8x1xf32> to vector<8x8xf32>
    %48 = arith.mulf %45, %47 : vector<8x8xf32>
    %49 = vector.extract_strided_slice %14 {offsets = [0, 16], sizes = [8, 8], strides = [1, 1]} : vector<8x32xbf16> to vector<8x8xbf16>
    %50 = vector.extract_strided_slice %15 {offsets = [0, 16], sizes = [16, 8], strides = [1, 1]} : vector<16x32xbf16> to vector<16x8xbf16>
    %51 = vector.extract_strided_slice %16 {offsets = [0, 16], sizes = [16, 8], strides = [1, 1]} : vector<16x32xbf16> to vector<16x8xbf16>
    %cst_20 = arith.constant dense<0.000000e+00> : vector<8x16xf32>
    %52 = tpu.matmul %49, %50, %cst_20 {dimension_numbers = #tpu.dot_dimension_numbers<[1], [1], [0], [0], [0, 0, 1, 0], [], []>} : vector<8x8xbf16>, vector<16x8xbf16>, vector<8x16xf32> -> vector<8x16xf32>
    %cst_21 = arith.constant dense<0xFF800000> : vector<8xf32>
    %53 = vector.multi_reduction <maximumf>, %52, %cst_21 [1] : vector<8x16xf32> to vector<8xf32>
    %54 = vector.shape_cast %53 : vector<8xf32> to vector<8x1xf32>
    %55 = vector.broadcast %54 : vector<8x1xf32> to vector<8x16xf32>
    %56 = arith.subf %52, %55 : vector<8x16xf32>
    %57 = math.exp %56 : vector<8x16xf32>
    %cst_22 = arith.constant dense<0.000000e+00> : vector<8xf32>
    %58 = vector.multi_reduction <add>, %57, %cst_22 [1] : vector<8x16xf32> to vector<8xf32>
    %59 = vector.shape_cast %58 : vector<8xf32> to vector<8x1xf32>
    %60 = arith.truncf %57 : vector<8x16xf32> to vector<8x16xbf16>
    %cst_23 = arith.constant dense<0.000000e+00> : vector<8x8xf32>
    %61 = tpu.matmul %60, %51, %cst_23 {dimension_numbers = #tpu.dot_dimension_numbers<[1], [0], [0], [1], [0, 0, 1, 1], [], []>} : vector<8x16xbf16>, vector<16x8xbf16>, vector<8x8xf32> -> vector<8x8xf32>
    %62 = tpu.reciprocal %59 {approx = true} : vector<8x1xf32> -> vector<8x1xf32>
    %63 = vector.broadcast %62 : vector<8x1xf32> to vector<8x8xf32>
    %64 = arith.mulf %61, %63 : vector<8x8xf32>
    %65 = vector.extract_strided_slice %14 {offsets = [0, 24], sizes = [8, 8], strides = [1, 1]} : vector<8x32xbf16> to vector<8x8xbf16>
    %66 = vector.extract_strided_slice %15 {offsets = [0, 24], sizes = [16, 8], strides = [1, 1]} : vector<16x32xbf16> to vector<16x8xbf16>
    %67 = vector.extract_strided_slice %16 {offsets = [0, 24], sizes = [16, 8], strides = [1, 1]} : vector<16x32xbf16> to vector<16x8xbf16>
    %cst_24 = arith.constant dense<0.000000e+00> : vector<8x16xf32>
    %68 = tpu.matmul %65, %66, %cst_24 {dimension_numbers = #tpu.dot_dimension_numbers<[1], [1], [0], [0], [0, 0, 1, 0], [], []>} : vector<8x8xbf16>, vector<16x8xbf16>, vector<8x16xf32> -> vector<8x16xf32>
    %cst_25 = arith.constant dense<0xFF800000> : vector<8xf32>
    %69 = vector.multi_reduction <maximumf>, %68, %cst_25 [1] : vector<8x16xf32> to vector<8xf32>
    %70 = vector.shape_cast %69 : vector<8xf32> to vector<8x1xf32>
    %71 = vector.broadcast %70 : vector<8x1xf32> to vector<8x16xf32>
    %72 = arith.subf %68, %71 : vector<8x16xf32>
    %73 = math.exp %72 : vector<8x16xf32>
    %cst_26 = arith.constant dense<0.000000e+00> : vector<8xf32>
    %74 = vector.multi_reduction <add>, %73, %cst_26 [1] : vector<8x16xf32> to vector<8xf32>
    %75 = vector.shape_cast %74 : vector<8xf32> to vector<8x1xf32>
    %76 = arith.truncf %73 : vector<8x16xf32> to vector<8x16xbf16>
    %cst_27 = arith.constant dense<0.000000e+00> : vector<8x8xf32>
    %77 = tpu.matmul %76, %67, %cst_27 {dimension_numbers = #tpu.dot_dimension_numbers<[1], [0], [0], [1], [0, 0, 1, 1], [], []>} : vector<8x16xbf16>, vector<16x8xbf16>, vector<8x8xf32> -> vector<8x8xf32>
    %78 = tpu.reciprocal %75 {approx = true} : vector<8x1xf32> -> vector<8x1xf32>
    %79 = vector.broadcast %78 : vector<8x1xf32> to vector<8x8xf32>
    %80 = arith.mulf %77, %79 : vector<8x8xf32>
    %81 = tpu.concatenate %32, %48, %64, %80 in 1 : vector<8x8xf32>, vector<8x8xf32>, vector<8x8xf32>, vector<8x8xf32> -> vector<8x32xf32>
    %82 = arith.truncf %81 : vector<8x32xf32> to vector<8x32xbf16>
    %c0_28 = arith.constant 0 : index
    %c0_29 = arith.constant 0 : index
    %83 = vector.load %arg9[%c0_28, %c0_29] : memref<32x32xf32, #tpu.memory_space<vmem>>, vector<32x32xf32>
    %84 = arith.truncf %83 : vector<32x32xf32> to vector<32x32xbf16>
    %cst_30 = arith.constant dense<0.000000e+00> : vector<8x32xf32>
    %85 = tpu.matmul %82, %84, %cst_30 {dimension_numbers = #tpu.dot_dimension_numbers<[1], [0], [0], [1], [0, 0, 1, 1], [], []>} : vector<8x32xbf16>, vector<32x32xbf16>, vector<8x32xf32> -> vector<8x32xf32>
    %c0_31 = arith.constant 0 : index
    %c0_32 = arith.constant 0 : index
    %86 = vector.load %arg10[%c0_31, %c0_32] : memref<1x32xf32, #tpu.memory_space<vmem>>, vector<1x32xf32>
    %87 = vector.broadcast %86 : vector<1x32xf32> to vector<8x32xf32>
    %88 = arith.addf %85, %87 : vector<8x32xf32>
    %c0_33 = arith.constant 0 : index
    %c0_34 = arith.constant 0 : index
    %c0_35 = arith.constant 0 : index
    %89 = vector.load %arg11[%c0_33, %c0_34, %c0_35] : memref<1x8x32xf32, #tpu.memory_space<vmem>>, vector<1x8x32xf32>
    %90 = vector.shape_cast %89 : vector<1x8x32xf32> to vector<8x32xf32>
    %91 = vector.shape_cast %88 : vector<8x32xf32> to vector<1x8x32xf32>
    tpu.vector_store %arg11[%c0_33, %c0_34, %c0_35], %91 {strides = array<i32>} : memref<1x8x32xf32, #tpu.memory_space<vmem>>, vector<1x8x32xf32>,
    return
  }
  func.func @transform_0(%arg0: i32, %arg1: i32) -> (i32, i32, i32) {
    %c0_i32 = arith.constant 0 : i32
    %c0_i32_0 = arith.constant 0 : i32
    return %arg0, %arg1, %c0_i32 : i32, i32, i32
  }
  func.func @transform_1(%arg0: i32, %arg1: i32) -> (i32, i32, i32) {
    %c0_i32 = arith.constant 0 : i32
    %c0_i32_0 = arith.constant 0 : i32
    %c0_i32_1 = arith.constant 0 : i32
    return %arg0, %c0_i32, %c0_i32_0 : i32, i32, i32
  }
  func.func @transform_2(%arg0: i32, %arg1: i32) -> (i32, i32, i32) {
    %c0_i32 = arith.constant 0 : i32
    %c0_i32_0 = arith.constant 0 : i32
    %c0_i32_1 = arith.constant 0 : i32
    return %arg0, %c0_i32, %c0_i32_0 : i32, i32, i32
  }
  func.func @transform_3(%arg0: i32, %arg1: i32) -> (i32, i32) {
    %c0_i32 = arith.constant 0 : i32
    %c0_i32_0 = arith.constant 0 : i32
    %c0_i32_1 = arith.constant 0 : i32
    return %c0_i32, %c0_i32_0 : i32, i32
  }
  func.func @transform_4(%arg0: i32, %arg1: i32) -> (i32, i32) {
    %c0_i32 = arith.constant 0 : i32
    %c0_i32_0 = arith.constant 0 : i32
    %c0_i32_1 = arith.constant 0 : i32
    return %c0_i32, %c0_i32_0 : i32, i32
  }
  func.func @transform_5(%arg0: i32, %arg1: i32) -> (i32, i32) {
    %c0_i32 = arith.constant 0 : i32
    %c0_i32_0 = arith.constant 0 : i32
    %c0_i32_1 = arith.constant 0 : i32
    return %c0_i32, %c0_i32_0 : i32, i32
  }
  func.func @transform_6(%arg0: i32, %arg1: i32) -> (i32, i32) {
    %c0_i32 = arith.constant 0 : i32
    %c0_i32_0 = arith.constant 0 : i32
    %c0_i32_1 = arith.constant 0 : i32
    return %c0_i32, %c0_i32_0 : i32, i32
  }
  func.func @transform_7(%arg0: i32, %arg1: i32) -> (i32, i32) {
    %c0_i32 = arith.constant 0 : i32
    %c0_i32_0 = arith.constant 0 : i32
    %c0_i32_1 = arith.constant 0 : i32
    return %c0_i32, %c0_i32_0 : i32, i32
  }
  func.func @transform_8(%arg0: i32, %arg1: i32) -> (i32, i32) {
    %c0_i32 = arith.constant 0 : i32
    %c0_i32_0 = arith.constant 0 : i32
    %c0_i32_1 = arith.constant 0 : i32
    return %c0_i32, %c0_i32_0 : i32, i32
  }
  func.func @transform_9(%arg0: i32, %arg1: i32) -> (i32, i32, i32) {
    %c0_i32 = arith.constant 0 : i32
    %c0_i32_0 = arith.constant 0 : i32
    return %arg0, %arg1, %c0_i32 : i32, i32, i32
  }
}

</mosaic_0001>

<bundles_post_ra>
// kernel: tpu_custom_call.1
= control target key start
LH: loop header
LB: loop body
LE: loop exit
PB: predicated region body
PF: predicated region fallthrough
CT: control target
= control target key end

     0   :  { %s2589_s0 = inlined_call_operand.hbm [shape: f32[2,16,32], index: 0, kind: input, shape index: {}]   ;;  %s2590_s1 = inlined_call_operand.hbm [shape: f32[2,16,32], index: 1, kind: input, shape index: {}]   ;;  %s2591_s2 = inlined_call_operand.hbm [shape: f32[2,16,32], index: 2, kind: input, shape index: {}]   ;;  %s2592_s3 = inlined_call_operand.hbm [shape: f32[32,32], index: 3, kind: input, shape index: {}]   ;;  %s2593_s4 = inlined_call_operand.vmem [shape: f32[1,32], index: 4, kind: input, shape index: {}]   ;;  %s2594_s5 = inlined_call_operand.hbm [shape: f32[32,32], index: 5, kind: input, shape index: {}]   ;;  %s2595_s6 = inlined_call_operand.vmem [shape: f32[1,32], index: 6, kind: input, shape index: {}]   ;;  %s2596_s7 = inlined_call_operand.hbm [shape: f32[32,32], index: 7, kind: input, shape index: {}]   ;;  %s2597_s8 = inlined_call_operand.vmem [shape: f32[1,32], index: 8, kind: input, shape index: {}]   ;;  %s2598_s9 = inlined_call_operand.hbm [shape: f32[2,16,32], index: 9, kind: output, shape index: {}]  }
   0x1   :  { %2629 = sst [smem:[#allocation31_spill]] %s2589_s0 }
   0x2   :  { %2630 = sst [smem:[#allocation32_spill]] %s2590_s1 }
   0x3   :  { %2631 = sst [smem:[#allocation33_spill]] %s2592_s3 }
   0x4   :  { %2632 = sst [smem:[#allocation34_spill]] %s2593_s4 }
   0x5   :  { %2633 = sst [smem:[#allocation35_spill]] %s2594_s5 }
   0x6   :  { %2634 = sst [smem:[#allocation36_spill]] %s2595_s6 }
   0x7   :  { %2635 = sst [smem:[#allocation37_spill]] %s2596_s7 }
   0x8   :  { %2636 = sst [smem:[#allocation38_spill]] %s2597_s8 }
   0x9   :  { %2637 = sst [smem:[#allocation39_spill]] %s2598_s9 }
   0xa   :  { %14 = vsyncpa [#allocation5], 0 }
   0xb   :  { %16 = vsyncpa [#allocation5 + $0x1], 0 }
   0xc   :  { %17 = vsyncpa [#allocation8], 0 }
   0xd   :  { %19 = vsyncpa [#allocation8 + $0x1], 0 }
   0xe   :  { %20 = vsyncpa [#allocation11], 0 }
   0xf   :  { %21 = vsyncpa [#allocation14], 0 }
  0x10   :  { %22 = vsyncpa [#allocation6], 0 }
  0x11   :  { %24 = vsyncpa [#allocation6 + $0x1], 0  ;;  %s2057_s30 = smov 0   ;;  %s2059_s10 = smov 0  }
  0x12   :  { %s2061_s11 = smov 0   ;;  %s2063_s12 = smov 0  }
  0x13   :  { %s2065_s13 = smov 0   ;;  %s2067_s14 = smov 0  }
  0x14   :  { %s2069_s15 = smov 0   ;;  %s2071_s16 = smov 0  }
  0x15   :  { %s2073_s17 = smov 0   ;;  %s2075_s18 = smov 0  }
  0x16   :  { %s2077_s19 = smov 0  }
  0x17 LB: > { %2638 = sst [smem:[#allocation21_spill]] %s1950_s10  ;;  %s2111_s20 = sadd.s32 4294967295, %s1986_s19   ;;  %s1986_s19 = sphi %s2077_s19, %s30_s19   ;;  %s1982_s18 = sphi %s2075_s18, %s2698_s18   ;;  %s1978_s17 = sphi %s2073_s17, %s2705_s17   ;;  %s1974_s16 = sphi %s2071_s16, %s2696_s16   ;;  %s1970_s15 = sphi %s2069_s15, %s2704_s15   ;;  %s1966_s14 = sphi %s2067_s14, %s2703_s14   ;;  %s1962_s13 = sphi %s2065_s13, %s2702_s13   ;;  %s1958_s12 = sphi %s2063_s12, %s2701_s12   ;;  %s1954_s11 = sphi %s2061_s11, %s2700_s11   ;;  %s1950_s10 = sphi %s2059_s10, %s2699_s10   ;;  %s1946_s30 = sphi %s2057_s30, %s2695_s30  }
  0x18   : > { %2639 = sst [smem:[#allocation22_spill]] %s1970_s15  ;;  %p90_p0 = scmp.ne.s32.totalorder %s1950_s10, %s1946_s30 }
  0x19   : > { %2640 = sst [smem:[#allocation23_spill]] %s1974_s16  ;;  %p2600_p1 = scmp.eq.s32.totalorder %s2111_s20, 0 }
  0x1a   : > { %2641 = sst [smem:[#allocation24_spill]] %s1982_s18  ;;  %p1353_p2 = scmp.ge.s32.totalorder %s1986_s19, 1 }
  0x1b   : > { %2642 = sst [smem:[#allocation25_spill]] %s2111_s20  ;;  %p281_p3 = scmp.lt.s32.totalorder %s1986_s19, 5 }
  0x1c   : > { %p2119_p4 = por %p90_p0, %p2600_p1  ;;  %s1988_s23 = smov [#allocation10]  }
  0x1d   : > { %p2123_p5 = pnand %p1353_p2, %p281_p3  ;;  %s293_s24 = sshll.u32 %s1988_s23, 4  ;;  %s294_s24 = int_to_ptr.vmem [resolvable:$true] %s293_s24 }
  0x1e   : > { %s2643_s21 = scalar_select %p2119_p4, 1, 0 }
  0x1f   : > { %s2645_s22 = scalar_select %p2123_p5, 1, 0 }
  0x20   : > { %2644 = sst [smem:[#allocation26_spill]] %s2643_s21  ;;  %p1527_p6 = pneg %p2123_p5 }
  0x21   : > { %2646 = sst [smem:[#allocation27_spill]] %s2645_s22  ;;  %s2648_s3 = sld [smem:[#allocation33_spill]] }
  0x22   : > { %p2131_p7 = pnand %p1527_p6, %p2600_p1 }
  0x24   : > { %s2647_s25 = scalar_select %p2131_p7, 1, 0 }
  0x25   : > { %p2144_p10 = pneg %p2131_p7 }
  0x27   : > { %s1678_s28 = scalar_lea.hbm %s2648_s3, 512 }
  0x28   : > { %p1679_p9 = scmp.ne.s32.totalorder %s2648_s3, %s1678_s28  ;;  %p1685_p13 = scmp.lt.u32.totalorder %s1678_s28, %s2648_s3 }
  0x2a   : > { %p1681_p11 = pnand %p2144_p10, %p1679_p9 }
  0x2c   : > { %p1682_p12 = pneg %p1681_p11 }
  0x2e   : > { %p1687_p0 = pnand %p1685_p13, %p1682_p12 }
  0x30   : > { %1690 = shalt.err (!%p1687_p0)
}
  0x31   : > { %s1691_s26 = scalar_lea.vmem %s294_s24, 512  ;;  %p1699_p1 = scmp.lt.s32.totalorder %s294_s24, %s294_s24 }
  0x32   : > { %p1692_p2 = scmp.ne.s32.totalorder %s294_s24, %s1691_s26  ;;  %p1700_p8 = scmp.lt.s32.totalorder %s1691_s26, %s1691_s26 }
  0x34   : > { %p1694_p3 = pnand %p1692_p2, %p2144_p10  ;;  %p1701_p4 = por %p1700_p8, %p1699_p1 }
  0x36   : > { %p1695_p6 = pneg %p1694_p3 }
  0x38   : > { %p1702_p5 = pnand %p1701_p4, %p1695_p6 }
  0x3a   : > { %1705 = shalt.err (!%p1702_p5)
}
  0x3b   : > { %s2604_s27 = smov 128   ;;  %s2606_s8 = smov 8  }
  0x3c   : > { %1530 = dma.hbm_to_vmem [thread:$0]  (!%p2131_p7), %s2648_s3, 512, %s294_s24, [#allocation11], %s2604_s27, %s2604_s27, %s2606_s8  }
  0x3d   : > { %p84_p1 = scmp.ne.s32.totalorder %s1954_s11, %s1950_s10  ;;  %p2608_p4 = scmp.lt.s32.totalorder %s1986_s19, 4 }
  0x3e   : > { %s362_s29 = sand.u32 1, %s1986_s19   ;;  %s364_s30 = sand.u32 1, %s1954_s11  }
  0x3f   : > { %p2650_p5 = scmp.eq.s32.totalorder %s1986_s19, 0  ;;  %s2170_s26 = sshll.u32 %s364_s30, 4 }
  0x40   : > { %s2603_s16 = sshll.u32 %s1982_s18, 8  ;;  %s2651_s1 = sld [smem:[#allocation32_spill]] }
  0x41   : > { %p86_p8 = por %p84_p1, %p2650_p5  ;;  %s366_s24 = scalar_lea.vmem [#allocation7], %s2170_s26 }
  0x42   : > { %s373_s9 = sshll.u32 %s366_s24, 4  ;;  %s2189_s30 = scalar_lea.sflag [#allocation8], %s362_s29  ;;  %s2187_s9 = int_to_ptr.vmem [resolvable:$true] %s373_s9 }
  0x43   : > { %p2183_p9 = pnand %p2608_p4, %p86_p8 }
  0x45   : > { %s2652_s28 = scalar_select %p2183_p9, 1, 0 }
  0x46   : > { %s2178_s15 = scalar_lea.hbm %s2651_s1, %s2603_s16  ;;  %p2621_p12 = pneg %p2183_p9 }
  0x47   : > { %2653 = sst [smem:[#allocation28_spill]] %s2652_s28  ;;  %s1706_s4 = scalar_lea.hbm %s2178_s15, 256 }
  0x48   : > { %p1707_p11 = scmp.ne.s32.totalorder %s2178_s15, %s1706_s4  ;;  %s1711_s16 = scalar_lea.hbm %s2651_s1, 512 }
  0x49   : > { %p1712_p2 = scmp.lt.u32.totalorder %s2178_s15, %s2651_s1  ;;  %p1713_p3 = scmp.lt.u32.totalorder %s1711_s16, %s1706_s4 }
  0x4a   : > { %p1709_p13 = pnand %p2621_p12, %p1707_p11  ;;  %p1715_p1 = scmp.lt.u32.totalorder %s1706_s4, %s2178_s15 }
  0x4b   : > { %p1714_p6 = por %p1713_p3, %p1712_p2 }
  0x4c   : > { %p1710_p0 = pneg %p1709_p13 }
  0x4d   : > { %p1716_p5 = por %p1715_p1, %p1714_p6 }
  0x4f   : > { %p1717_p8 = pnand %p1716_p5, %p1710_p0 }
  0x51   : > { %1720 = shalt.err (!%p1717_p8)
}
  0x52   : > { %s1721_s29 = scalar_lea.vmem %s2187_s9, 256  ;;  %s1991_s6 = smov [#allocation7]  }
  0x53   : > { %p1722_p11 = scmp.ne.s32.totalorder %s2187_s9, %s1721_s29  ;;  %s1726_s24 = sshll.u32 %s1991_s6, 4  ;;  %s1727_s24 = int_to_ptr.vmem [resolvable:$false] %s1726_s24 }
  0x54   : > { %s1728_s27 = scalar_lea.vmem %s1727_s24, 512  ;;  %p1729_p7 = scmp.lt.s32.totalorder %s2187_s9, %s1727_s24 }
  0x55   : > { %p1724_p13 = pnand %p1722_p11, %p2621_p12  ;;  %p1730_p2 = scmp.lt.s32.totalorder %s1728_s27, %s1721_s29 }
  0x57   : > { %p1725_p4 = pneg %p1724_p13  ;;  %p1731_p3 = por %p1730_p2, %p1729_p7 }
  0x59   : > { %p1732_p6 = pnand %p1731_p3, %p1725_p4 }
  0x5b   : > { %1735 = shalt.err (!%p1732_p6)
}
  0x5c   : > { %s2654_s16 = smov 8   ;;  %s2655_s8 = smov 128  }
  0x5d   : > { %1543 = dma.hbm_to_vmem [thread:$0]  (!%p2183_p9), %s2178_s15, 256, %s2187_s9, %s2189_s30, %s2655_s8, %s2655_s8, %s2654_s16  }
  0x5e   : > { %s2656_s4 = sshll.u32 %s1982_s18, 8  ;;  %s387_s24 = scalar_lea.vmem [#allocation9], %s2170_s26 }
  0x5f   : > { %s2225_s29 = scalar_lea.hbm %s2591_s2, %s2656_s4  ;;  %s2228_s27 = sshll.u32 %s387_s24, 4  ;;  %s2273_s27 = int_to_ptr.vmem [resolvable:$true] %s2228_s27 }
  0x60   : > { %s1992_s3 = smov [#allocation12]   ;;  %s2657_s5 = sld [smem:[#allocation35_spill]] }
  0x61   : > { %s309_s21 = sshll.u32 %s1992_s3, 4  ;;  %s310_s21 = int_to_ptr.vmem [resolvable:$true] %s309_s21 }
  0x66   : > { %s1736_s0 = scalar_lea.hbm %s2657_s5, 512 }
  0x67   : > { %p1737_p7 = scmp.ne.s32.totalorder %s2657_s5, %s1736_s0  ;;  %p1743_p1 = scmp.lt.u32.totalorder %s1736_s0, %s2657_s5 }
  0x69   : > { %p1739_p4 = pnand %p1737_p7, %p2144_p10 }
  0x6b   : > { %p1740_p0 = pneg %p1739_p4 }
  0x6d   : > { %p1745_p5 = pnand %p1743_p1, %p1740_p0 }
  0x6f   : > { %1748 = shalt.err (!%p1745_p5)
}
  0x70   : > { %s1749_s26 = scalar_lea.vmem %s310_s21, 512  ;;  %p1757_p2 = scmp.lt.s32.totalorder %s310_s21, %s310_s21 }
  0x71   : > { %p1750_p8 = scmp.ne.s32.totalorder %s310_s21, %s1749_s26  ;;  %p1758_p3 = scmp.lt.s32.totalorder %s1749_s26, %s1749_s26 }
  0x73   : > { %p1752_p11 = pnand %p1750_p8, %p2144_p10  ;;  %p1759_p6 = por %p1758_p3, %p1757_p2 }
  0x75   : > { %p1753_p13 = pneg %p1752_p11 }
  0x77   : > { %p1760_p12 = pnand %p1759_p6, %p1753_p13 }
  0x79   : > { %1763 = shalt.err (!%p1760_p12)
}
  0x7a   : > { %p2658_p7 = scmp.ne.s32.totalorder %s2647_s25, 0  ;;  %s1993_s10 = smov [#allocation13]  }
  0x7b   : > { %s325_s20 = sshll.u32 %s1993_s10, 4  ;;  %s2659_s7 = sld [smem:[#allocation37_spill]]  ;;  %s326_s20 = int_to_ptr.vmem [resolvable:$true] %s325_s20 }
  0x7c   : > { %1533 = dma.hbm_to_vmem [thread:$0]  (!%p2658_p7), %s2657_s5, 512, %s310_s21, [#allocation11], %s2655_s8, %s2655_s8, %s2654_s16  }
  0x81   : > { %s1764_s28 = scalar_lea.hbm %s2659_s7, 512 }
  0x82   : > { %p1765_p12 = scmp.ne.s32.totalorder %s2659_s7, %s1764_s28  ;;  %p1771_p1 = scmp.lt.u32.totalorder %s1764_s28, %s2659_s7 }
  0x84   : > { %p1767_p4 = pnand %p1765_p12, %p2144_p10 }
  0x86   : > { %p1768_p0 = pneg %p1767_p4 }
  0x88   : > { %p1773_p5 = pnand %p1771_p1, %p1768_p0 }
  0x8a   : > { %1776 = shalt.err (!%p1773_p5)
}
  0x8b   : > { %s1777_s21 = scalar_lea.vmem %s326_s20, 512  ;;  %p1785_p2 = scmp.lt.s32.totalorder %s326_s20, %s326_s20 }
  0x8c   : > { %p1778_p8 = scmp.ne.s32.totalorder %s326_s20, %s1777_s21  ;;  %p1786_p3 = scmp.lt.s32.totalorder %s1777_s21, %s1777_s21 }
  0x8e   : > { %p1780_p11 = pnand %p1778_p8, %p2144_p10  ;;  %p1787_p6 = por %p1786_p3, %p1785_p2 }
  0x90   : > { %p1781_p13 = pneg %p1780_p11 }
  0x92   : > { %p1788_p9 = pnand %p1787_p6, %p1781_p13 }
  0x94   : > { %1791 = shalt.err (!%p1788_p9)
}
  0x95   : > { %s2660_s23 = sld [smem:[#allocation25_spill]]  ;;  %s39_s25 = sadd.s32 1, %s1978_s17 }
  0x96   : > { %1536 = dma.hbm_to_vmem [thread:$0]  (!%p2658_p7), %s2659_s7, 512, %s326_s20, [#allocation14], %s2655_s8, %s2655_s8, %s2654_s16  }
  0x97   : > { %p40_p10 = scmp.ge.s32.totalorder %s39_s25, 2  ;;  %s42_s3 = sadd.s32 1, %s1982_s18 }
  0x98   : > { %s1352_s0 = sadd.s32 4294967294, %s1986_s19   ;;  %s51_s10 = sadd.s32 1, %s1966_s14 }
  0x99   : > { %s2707_s25 = smov (%p40_p10, %s39_s25), 0  ;;  %s2709_s3 = smov (!%p40_p10, %s42_s3), %s1982_s18 }
  0x9a   : > { %2661 = sst [smem:[#allocation29_spill]] %s2707_s25  ;;  %s47_s22 = ssub.s32 %s1978_s17, %s2707_s25 }
  0x9b   : > { %p58_p9 = scmp.ne.s32.totalorder %s1966_s14, %s1962_s13  ;;  %p44_p7 = scmp.ge.s32.totalorder %s2709_s3, 2 }
  0x9c   : > { %p64_p12 = scmp.ne.s32.totalorder %s1962_s13, %s1958_s12  ;;  %s77_s20 = sadd.s32 1, %s1954_s11 }
  0x9d   : > { %p268_p4 = scmp.eq.s32.totalorder %s2660_s23, 3  ;;  %s2711_s3 = smov (%p44_p7, %s2709_s3), 0 }
  0x9e   : > { %2662 = sst [smem:[#allocation30_spill]] %s2711_s3  ;;  %p2663_p0 = scmp.eq.s32.totalorder %s2660_s23, 0 }
  0x9f   : > { %p2301_p5 = por %p268_p4, %p58_p9  ;;  %s46_s4 = ssub.s32 %s1982_s18, %s2711_s3 }
  0xa0   : > { %p2294_p1 = por %p2663_p0, %p64_p12  ;;  %p274_p8 = scmp.eq.s32.totalorder %s1352_s0, 3 }
  0xa1   : > { %s2665_s28 = scalar_select %p2301_p5, 1, 0 }
  0xa2   : > { %s2664_s9 = scalar_select %p2294_p1, 1, 0 }
  0xa3   : > { %s48_s6 = sor.u32 %s47_s22, %s46_s4  ;;  %p75_p11 = scmp.eq.s32.totalorder %s46_s4, 0 }
  0xa4   : > { %p49_p13 = scmp.eq.s32.totalorder %s48_s6, 0  ;;  %p2307_p2 = por %p274_p8, %p64_p12 }
  0xa5   : > { %s2667_s1 = sld [smem:[#allocation28_spill]]  ;;  %s342_s26 = sand.u32 1, %s1966_s14  }
  0xa6   : > { %s2666_s24 = scalar_select %p2307_p2, 1, 0 }
  0xa7   : > { %s2312_s21 = scalar_select %p75_p11, %s1954_s11, %s77_s20  }
  0xa8   : > { %s2315_s15 = scalar_select %p49_p13, %s1966_s14, %s51_s10  }
  0xa9   : > { %s1359_s23 = sshll.u32 %s1982_s18, 1  ;;  %p2668_p3 = scmp.eq.s32.totalorder %s1986_s19, 0 }
  0xaa   : > { %s1358_s0 = sshll.u32 %s342_s26, 3  ;;  %s351_s22 = sadd.s32 %s1978_s17, %s1359_s23 }
  0xab   : > { %p60_p6 = por %p2668_p3, %p58_p9  ;;  %s1360_s4 = sshll.u32 %s351_s22, 7 }
  0xac   : > { %s346_s6 = scalar_lea.vmem [#allocation4], %s1358_s0  ;;  %s2669_s25 = sld [smem:[#allocation31_spill]] }
  0xad   : > { %s355_s5 = sshll.u32 %s346_s6, 4  ;;  %p2670_p10 = scmp.lt.s32.totalorder %s1986_s19, 4  ;;  %s2332_s5 = int_to_ptr.vmem [resolvable:$true] %s355_s5 }
  0xae   : > { %s1792_s18 = scalar_lea.hbm %s2225_s29, 256  ;;  %p2672_p12 = scmp.ne.s32.totalorder %s2667_s1, 0 }
  0xaf   : > { %p2336_p7 = pnand %p2670_p10, %p60_p6  ;;  %p1793_p9 = scmp.ne.s32.totalorder %s2225_s29, %s1792_s18 }
  0xb0   : > { %p2673_p4 = pneg %p2672_p12  ;;  %s1797_s22 = scalar_lea.hbm %s2591_s2, 512 }
  0xb1   : > { %p1798_p11 = scmp.lt.u32.totalorder %s2225_s29, %s2591_s2  ;;  %p1799_p13 = scmp.lt.u32.totalorder %s1797_s22, %s1792_s18 }
  0xb2   : > { %s2330_s20 = scalar_lea.hbm %s2669_s25, %s1360_s4  ;;  %p1795_p0 = pnand %p1793_p9, %p2673_p4 }
  0xb3   : > { %p1800_p3 = por %p1799_p13, %p1798_p11  ;;  %p1801_p6 = scmp.lt.u32.totalorder %s1792_s18, %s2225_s29 }
  0xb4   : > { %p1796_p8 = pneg %p1795_p0 }
  0xb5   : > { %p1802_p10 = por %p1801_p6, %p1800_p3 }
  0xb7   : > { %p1803_p2 = pnand %p1802_p10, %p1796_p8 }
  0xb9   : > { %1806 = shalt.err (!%p1803_p2)
}
  0xba   : > { %s1807_s4 = scalar_lea.vmem %s2273_s27, 256  ;;  %s1994_s6 = smov [#allocation9]  }
  0xbb   : > { %p1808_p9 = scmp.ne.s32.totalorder %s2273_s27, %s1807_s4  ;;  %s1812_s23 = sshll.u32 %s1994_s6, 4  ;;  %s1813_s23 = int_to_ptr.vmem [resolvable:$false] %s1812_s23 }
  0xbc   : > { %s1814_s0 = scalar_lea.vmem %s1813_s23, 512  ;;  %p1815_p1 = scmp.lt.s32.totalorder %s2273_s27, %s1813_s23 }
  0xbd   : > { %p1810_p0 = pnand %p1808_p9, %p2673_p4  ;;  %p1816_p11 = scmp.lt.s32.totalorder %s1814_s0, %s1807_s4 }
  0xbf   : > { %p1811_p5 = pneg %p1810_p0  ;;  %p1817_p13 = por %p1816_p11, %p1815_p1 }
  0xc1   : > { %p1818_p3 = pnand %p1817_p13, %p1811_p5 }
  0xc3   : > { %1821 = shalt.err (!%p1818_p3)
}
  0xc4   : > { %1546 = dma.hbm_to_vmem [thread:$0]  (!%p2672_p12), %s2225_s29, 256, %s2273_s27, %s2189_s30, %s2655_s8, %s2655_s8, %s2654_s16  }
  0xc5   : > { %s343_s18 = scalar_lea.sflag [#allocation5], %s342_s26  ;;  %s1822_s22 = scalar_lea.hbm %s2330_s20, 128 }
  0xc6   : > { %p1823_p1 = scmp.ne.s32.totalorder %s2330_s20, %s1822_s22  ;;  %p1824_p5 = pneg %p2336_p7 }
  0xc7   : > { %s1827_s3 = scalar_lea.hbm %s2669_s25, 512  ;;  %p1828_p6 = scmp.lt.u32.totalorder %s2330_s20, %s2669_s25 }
  0xc8   : > { %p1825_p2 = pnand %p1824_p5, %p1823_p1  ;;  %p1829_p10 = scmp.lt.u32.totalorder %s1827_s3, %s1822_s22 }
  0xc9   : > { %p1831_p9 = scmp.lt.u32.totalorder %s1822_s22, %s2330_s20 }
  0xca   : > { %p1826_p8 = pneg %p1825_p2  ;;  %p1830_p12 = por %p1829_p10, %p1828_p6 }
  0xcc   : > { %p1832_p4 = por %p1831_p9, %p1830_p12 }
  0xce   : > { %p1833_p0 = pnand %p1832_p4, %p1826_p8 }
  0xd0   : > { %1836 = shalt.err (!%p1833_p0)
}
  0xd1   : > { %s1837_s30 = scalar_lea.vmem %s2332_s5, 128  ;;  %s1995_s16 = smov [#allocation4]  }
  0xd2   : > { %p1838_p11 = scmp.ne.s32.totalorder %s2332_s5, %s1837_s30  ;;  %s1842_s8 = sshll.u32 %s1995_s16, 4  ;;  %s1843_s8 = int_to_ptr.vmem [resolvable:$false] %s1842_s8 }
  0xd3   : > { %s1844_s29 = scalar_lea.vmem %s1843_s8, 256  ;;  %p1845_p1 = scmp.lt.s32.totalorder %s2332_s5, %s1843_s8 }
  0xd4   : > { %p1840_p13 = pnand %p1838_p11, %p1824_p5  ;;  %p1846_p2 = scmp.lt.s32.totalorder %s1844_s29, %s1837_s30 }
  0xd6   : > { %p1841_p3 = pneg %p1840_p13  ;;  %p1847_p6 = por %p1846_p2, %p1845_p1 }
  0xd8   : > { %p1848_p10 = pnand %p1847_p6, %p1841_p3 }
  0xda   : > { %1851 = shalt.err (!%p1848_p10)
}
  0xdb   : > { %1540 = dma.hbm_to_vmem [thread:$0]  (!%p2336_p7), %s2330_s20, 128, %s2332_s5, %s343_s18  }
  0xdc   : > { %s2674_s27 = sld [smem:[#allocation27_spill]] }
  0xe2   : > { %p2675_p8 = scmp.ne.s32.totalorder %s2674_s27, 0 }
  0xe3   : > { %s2397_s26 = sand.u32 (!%p2675_p8), 1, %s1962_s13   ;;  %p2676_p5 = scmp.ne.s32.totalorder (!%p2675_p8), %s2664_s9, 0 }
  0xe4   : > { %406 = sbr.rel (%p2675_p8) target bundleno = 1780 (0x6f4), region = 56  ;;  %s1368_s23 = sshll.u32 (!%p2675_p8), %s2397_s26, 3 }
  0xe5   : > { %s409_s0 = scalar_lea.sflag (!%p2675_p8), [#allocation5], %s2397_s26  ;;  %s2401_s22 = scalar_lea.vmem (!%p2675_p8), [#allocation4], %s1368_s23 }
  0xeb   : > { %1925 = dma.done.wait (%p2676_p5), %s409_s0, 128  }
  0xec   : > { %1927 = vsyncadd (%p2676_p5), %s409_s0, 4294967168  ;;  %s2677_s10 = sld [smem:[#allocation25_spill]]  ;;  %s2678_s5 = sld [smem:[#allocation21_spill]] }
  0xed   : > { %s2679_s20 = sld [smem:[#allocation26_spill]] }
  0xf2   : > { %s417_s18 = sand.u32 1, %s2677_s10   ;;  %s419_s1 = sand.u32 1, %s2678_s5  }
  0xf3   : > { %s2409_s7 = sshll.u32 %s419_s1, 4  ;;  %s418_s3 = scalar_lea.sflag [#allocation8], %s417_s18 }
  0xf4   : > { %s421_s4 = scalar_lea.vmem [#allocation7], %s2409_s7  ;;  %p2680_p7 = scmp.ne.s32.totalorder %s2679_s20, 0 }
  0xf6   : > { %1929 = dma.done.wait (%p2680_p7), %s418_s3, 512  }
  0xf7   : > { %1931 = vsyncadd (%p2680_p7), %s418_s3, 4294966784  ;;  %s430_s6 = scalar_lea.vmem [#allocation9], %s2409_s7  ;;  %p2681_p12 = scmp.eq.s32.totalorder %s2677_s10, 0 }
  0xf9   : > { %1933 = dma.done.wait (%p2681_p12), [#allocation11], 1024   ;;  %p2682_p9 = pmov %p2681_p12 }
  0xfb   : > { %1935 = vsyncadd (%p2682_p9), [#allocation11], 4294966272  ;;  %p2683_p4 = pmov %p2682_p9 }
  0xfd   : > { %1937 = dma.done.wait (%p2683_p4), [#allocation14], 512   ;;  %p2684_p0 = pmov %p2683_p4 }
  0xfe   : > { %v488_v0 = vld [vmem:[#allocation10] sm:$0xff]  ;;  %v489_v1 = vld [vmem:[#allocation10 + $0x8] sm:$0xff]  ;;  %v490_v2 = vld [vmem:[#allocation10 + $0x10] sm:$0xff]  ;;  %s2427_s9 = scalar_lea.vmem [#allocation15], %s1368_s23  ;;  %s2685_s30 = sld [smem:[#allocation22_spill]] }
  0xff   : > { %1939 = vsyncadd (%p2684_p0), [#allocation14], 4294966784  ;;  %v491_v3 = vld [vmem:[#allocation10 + $0x18] sm:$0xff]  ;;  %v492_v4 = vpack.c.bf16 %v489_v1, %v488_v0 }
 0x100   : > { %v2425_v5 = vpack.c.bf16 %v491_v3, %v490_v2 }
 0x104   : > { %p1375_p11 = scmp.ne.s32.totalorder %s2685_s30, 0 }
 0x105   : > { %v504_v6 = vld [vmem:[#allocation12] sm:$0xff] (!%p1375_p11)  ;;  %v505_v7 = vld [vmem:[#allocation12 + $0x8] sm:$0xff] (!%p1375_p11)  ;;  %v506_v8 = vld [vmem:[#allocation12 + $0x10] sm:$0xff] (!%p1375_p11)  ;;  %v1996_v9 = vmov (!%p1375_p11), 0.0   ;;  %vm1997_vm0 = vmmov (!%p1375_p11), 0   ;;  %vm517_vm1 = vcmask (!%p1375_p11), 261120  }
 0x106   : > { %497 = sbr.rel (%p1375_p11) target bundleno = 490 (0x1ea), region = 84  ;;  %1427 = vmatprep.subr.bf16.mxu0 (!%p1375_p11), %v1996_v9  ;;  %1435 = vmatprep.subr.bf16.mxu1 (!%p1375_p11), %v1996_v9  ;;  %v508_v10 = vpack.c.bf16 (!%p1375_p11), %v505_v7, %v504_v6  ;;  %v507_v11 = vld [vmem:[#allocation12 + $0x18] sm:$0xff] (!%p1375_p11)  ;;  %v498_v12 = vld [vmem:[%s421_s4] sm:$0xff] (!%p1375_p11)  ;;  %s2686_s29 = sld [smem:[#allocation34_spill]] (!%p1375_p11) }
 0x107   : > { %1428 = vmatpush3.bf16.msra.mxu0 (!%p1375_p11), %v492_v4  ;;  %1431 = vmatprep.mubr.msk.bf16.mxu0 (!%p1375_p11), %vm1997_vm0, %v1996_v9  ;;  %v499_v13 = vld [vmem:[%s421_s4 + $0x8] sm:$0xff] (!%p1375_p11)  ;;  %v509_v14 = vpack.c.bf16 (!%p1375_p11), %v507_v11, %v506_v8  ;;  %v501_v15 = vld [vmem:[%s430_s6] sm:$0xff] (!%p1375_p11)  ;;  %s2687_s0 = sld [smem:[#allocation36_spill]] (!%p1375_p11) }
 0x108   : > { %1436 = vmatpush3.bf16.msra.mxu1 (!%p1375_p11), %v508_v10  ;;  %1429 = vmatprep.subr.bf16.mxu0 (!%p1375_p11), %v1996_v9  ;;  %v502_v16 = vld [vmem:[%s430_s6 + $0x8] sm:$0xff] (!%p1375_p11)  ;;  %v500_v17 = vpack.c.bf16 (!%p1375_p11), %v499_v13, %v498_v12 }
 0x109   : > { %1437 = vmatprep.subr.bf16.mxu1 (!%p1375_p11), %v1996_v9  ;;  %1439 = vmatprep.mubr.msk.bf16.mxu1 (!%p1375_p11), %vm1997_vm0, %v1996_v9  ;;  %v503_v18 = vpack.c.bf16 (!%p1375_p11), %v502_v16, %v501_v15 }
 0x10b   : > { %1430 = vmatpush3.bf16.msra.mxu0 (!%p1375_p11), %v2425_v5 }
 0x10c   : > { %1438 = vmatpush3.bf16.msra.mxu1 (!%p1375_p11), %v509_v14  ;;  %v1376_v19 = vld [vmem:[%s2686_s29] ss:$0 sm:$0xff] (!%p1375_p11) }
 0x10d   : > { %v1378_v23 = vld [vmem:[%s2687_s0] ss:$0 sm:$0xff] }
 0x10e   : > { %1432 = vmatmul.mubr.msk.bf16.vlgmr.msra.gmra.mrb[0].mxu0 %vm517_vm1, %v500_v17 }
 0x10f   : > { %1440 = vmatmul.mubr.msk.bf16.vlgmr.msra.gmra.mrb[0].mxu1 %vm517_vm1, %v503_v18 }
 0x1e1   : > { %v555_v20 = vpop.f32.mrb[0].mxu0 }
 0x1e2   : > { %v556_v21 = vadd.f32 %v1376_v19, %v555_v20  ;;  %v1433_v22 = vpop.f32.mrb[1].mxu0  ;;  %v606_v24 = vpop.f32.mrb[0].mxu1 }
 0x1e3   : > { %v558_v25 = vpop.f32.mrb[2].mxu0  ;;  %v1441_v26 = vpop.f32.mrb[1].mxu1  ;;  %v607_v30 = vadd.f32 %v1378_v23, %v606_v24 }
 0x1e4   : > { %v559_v27 = vadd.f32 %v1376_v19, %v558_v25  ;;  %v1434_v28 = vpop.f32.mrb[3].mxu0  ;;  %v609_v29 = vpop.f32.mrb[2].mxu1 }
 0x1e5   : > { %v610_v31 = vadd.f32 %v1378_v23, %v609_v29  ;;  %v1442_v32 = vpop.f32.mrb[3].mxu1 }
 0x1e6   : > { %v613_v33 = vpack.c.bf16 %v559_v27, %v556_v21 }
 0x1e7   : > { %v615_v34 = vpack.c.bf16 %v610_v31, %v607_v30 }
 0x1e8   : > { %614 = vst.msk [vmem:[#allocation2] sm:$0xff] %vm517_vm1, %v613_v33 }
 0x1e9   : > { %616 = vst.msk [vmem:[#allocation3] sm:$0xff] %vm517_vm1, %v615_v34 }
 0x1ea PF: > { %v1998_v36 = vmov 0.0   ;;  %vm1999_vm2 = vmmov 0   ;;  %v617_v37 = vld [vmem:[%s2401_s22] sm:$0xff]  ;;  %s2000_s10 = smov 120   ;;  %vm626_vm3 = vcmask 261120   ;;  %vm674_vm4 = vcmask 64512  }
 0x1eb   : > { %1443 = vmatprep.subr.bf16.mxu0 %v1998_v36  ;;  %1447 = vmatprep.mubr.msk.bf16.mxu0 %vm1999_vm2, %v1998_v36  ;;  %v618_v38 = vpack.c.bf16 %v617_v37, %v617_v37  ;;  %s2001_s22 = smov 112   ;;  %s2688_s18 = sld [smem:[#allocation34_spill]]  ;;  %vm721_vm5 = vcmask 130048   ;;  %vm1118_vm6 = vcmask 195584  }
 0x1ec   : > { %1444 = vmatpush3.bf16.msra.mxu0 %v492_v4  ;;  %1451 = vmatprep.subr.bf16.mxu1 %v1998_v36  ;;  %s2002_s1 = smov 104   ;;  %s2003_s7 = smov 8  }
 0x1ed   : > { %1445 = vmatprep.subr.bf16.mxu0 %v1998_v36  ;;  %1453 = vmatprep.mubr.msk.bf16.mxu1 %vm1999_vm2, %v1998_v36  ;;  %s2004_s3 = smov 16   ;;  %s2005_s4 = smov 24  }
 0x1ee   : > { %s2689_s6 = sld [smem:[#allocation23_spill]]  ;;  %s2690_s30 = sld [smem:[#allocation22_spill]] }
 0x1ef   : > { %v672_v35 = vld [vmem:[#allocation2] sm:$0xff]  ;;  %s2691_s23 = sld [smem:[#allocation38_spill]]  ;;  %s2692_s20 = sld [smem:[#allocation39_spill]] }
 0x1f0   : > { %781 = vrot.lane.b32.xlu0 %v672_v35, %s2000_s10  ;;  %1446 = vmatpush3.bf16.msra.mxu0 %v2425_v5  ;;  %v679_v39 = vsel %vm674_vm4, %v672_v35, 0  ;;  %v673_v62 = vld [vmem:[#allocation3] sm:$0xff]  ;;  %p2693_p3 = scmp.ne.s32.totalorder %s2665_s28, 0 }
 0x1f1   : > { %1457 = vmatprep.subr.bf16.mxu0 %v1998_v36  ;;  %1452 = vmatpush3.bf16.xpose.msra.mxu1 %v679_v39  ;;  %v1380_v40 = vld [vmem:[%s2688_s18] ss:$0 sm:$0xff] }
 0x1f2   : > { %1463 = vmatprep.subr.bf16.mxu1 %v1998_v36  ;;  %890 = vrot.lane.b32.xlu1 %v672_v35, %s2001_s22 }
 0x1f3   : > { %1448 = vmatmul.mubr.msk.bf16.vlgmr.msra.gmra.mrb[0].mxu0 %vm626_vm3, %v618_v38 }
 0x1f4   : > { %1459 = vmatprep.mubr.msk.bf16.mxu0 %vm1999_vm2, %v1998_v36  ;;  %1458 = vmatpush3.bf16.msra.mxu0 %v673_v62  ;;  %s1393_s16 = sshll.u32 %s2689_s6, 1 }
 0x1f5   : > { %1469 = vmatprep.subr.bf16.mxu0 %v1998_v36  ;;  %s1190_s8 = sadd.s32 %s2690_s30, %s1393_s16 }
 0x1f6   : > { %s1394_s0 = sshll.u32 %s1190_s8, 7 }
 0x1f7   : > { %s2524_s18 = scalar_lea.hbm %s2692_s20, %s1394_s0 }
 0x262   : > { %v782_v47 = vpop.permute.xlu0 %781 }
 0x263   : > { %v787_v49 = vsel %vm674_vm4, %v782_v47, 0 }
 0x264   : > { %v891_v50 = vpop.permute.xlu1 %890 }
 0x265   : > { %v896_v51 = vsel %vm674_vm4, %v891_v50, 0 }
 0x2c6   : > { %v664_v41 = vpop.f32.mrb[0].mxu0 }
 0x2c7   : > { %v665_v42 = vadd.f32 %v1380_v40, %v664_v41  ;;  %v1449_v43 = vpop.f32.mrb[1].mxu0 }
 0x2c8   : > { %v667_v44 = vpop.f32.mrb[2].mxu0 }
 0x2c9   : > { %v670_v45 = vmul.f32 0.35355338, %v665_v42  ;;  %v1450_v46 = vpop.f32.mrb[3].mxu0 }
 0x2cb   : > { %v671_v48 = vpack.c.bf16 %v670_v45, %v670_v45 }
 0x2cd   : > { %888 = vrot.lane.b32.xlu1 %v671_v48, %s2001_s22  ;;  %778 = vrot.lane.b32.xlu0 %v671_v48, %s2000_s10 }
 0x2ce   : > { %1454 = vmatmul.mubr.msk.bf16.vlgmr.msra.gmra.mrb[0].mxu1 %vm674_vm4, %v671_v48 }
 0x2cf   : > { %1464 = vmatpush3.bf16.xpose.msra.mxu1 %v787_v49  ;;  %1465 = vmatprep.mubr.msk.bf16.mxu1 %vm1999_vm2, %v1998_v36  ;;  %v1122_v49 = vld [vmem:[#allocation13 + $0x8] sm:$0xff] }
 0x2d0   : > { %1475 = vmatprep.subr.bf16.mxu1 %v1998_v36 }
 0x2d1   : > { %996 = vrot.lane.b32.xlu1 %v671_v48, %s2002_s1  ;;  %998 = vrot.lane.b32.xlu0 %v672_v35, %s2002_s1  ;;  %v1121_v48 = vld [vmem:[#allocation13] sm:$0xff] }
 0x2d2   : > { %v1125_v50 = vpack.c.bf16 %v1122_v49, %v1121_v48 }
 0x33f   : > { %v779_v52 = vpop.permute.xlu0 %778  ;;  %v889_v55 = vpop.permute.xlu1 %888 }
 0x340   : > { %1466 = vmatmul.mubr.msk.bf16.vlgmr.msra.gmra.mrb[4].mxu1 %vm674_vm4, %v779_v52 }
 0x341   : > { %1476 = vmatpush3.bf16.xpose.msra.mxu1 %v896_v51  ;;  %1477 = vmatprep.mubr.msk.bf16.mxu1 %vm1999_vm2, %v1998_v36 }
 0x342   : > { %1487 = vmatprep.subr.bf16.mxu1 %v1998_v36 }
 0x343   : > { %v999_v53 = vpop.permute.xlu0 %998  ;;  %v997_v56 = vpop.permute.xlu1 %996 }
 0x344   : > { %v1004_v54 = vsel %vm674_vm4, %v999_v53, 0 }
 0x348   : > { %1478 = vmatmul.mubr.msk.bf16.vlgmr.msra.gmra.mrb[8].mxu1 %vm674_vm4, %v889_v55 }
 0x349   : > { %1488 = vmatpush3.bf16.xpose.msra.mxu1 %v1004_v54  ;;  %1489 = vmatprep.mubr.msk.bf16.mxu1 %vm1999_vm2, %v1998_v36 }
 0x34a   : > { %1499 = vmatprep.subr.bf16.mxu1 %v1998_v36 }
 0x350   : > { %1490 = vmatmul.mubr.msk.bf16.vlgmr.msra.gmra.mrb[12].mxu1 %vm674_vm4, %v997_v56 }
 0x351   : > { %1503 = vmatprep.mubr.msk.bf16.mxu1 %vm1999_vm2, %v1998_v36  ;;  %1500 = vmatpush3.bf16.msra.mxu1 %v1125_v50 }
 0x352   : > { %1501 = vmatprep.subr.bf16.mxu1 %v1998_v36 }
 0x3a1   : > { %v715_v57 = vpop.f32.mrb[0].mxu1 }
 0x3a2   : > { %v1455_v58 = vpop.f32.mrb[1].mxu1  ;;  %v722_v59 = vsel %vm721_vm5, %v715_v57, -inf }
 0x3a3   : > { %723 = vmax.xlane.f32.xlu0 %v722_v59  ;;  %v718_v60 = vpop.f32.mrb[2].mxu1  ;;  %v1123_v58 = vld [vmem:[#allocation13 + $0x10] sm:$0xff]  ;;  %v1124_v59 = vld [vmem:[#allocation13 + $0x18] sm:$0xff] }
 0x3a4   : > { %v1456_v61 = vpop.f32.mrb[3].mxu1  ;;  %v1126_v60 = vpack.c.bf16 %v1124_v59, %v1123_v58 }
 0x3a6   : > { %1502 = vmatpush3.bf16.msra.mxu1 %v1126_v60 }
 0x413   : > { %v823_v63 = vpop.f32.mrb[4].mxu1 }
 0x414   : > { %v1467_v0 = vpop.f32.mrb[5].mxu1  ;;  %v829_v1 = vsel %vm721_vm5, %v823_v63, -inf }
 0x415   : > { %830 = vmax.xlane.f32.xlu1 %v829_v1  ;;  %v826_v2 = vpop.f32.mrb[6].mxu1 }
 0x416   : > { %v1468_v3 = vpop.f32.mrb[7].mxu1 }
 0x41b   : > { %v932_v4 = vpop.f32.mrb[8].mxu1 }
 0x41c   : > { %v1479_v5 = vpop.f32.mrb[9].mxu1  ;;  %v938_v6 = vsel %vm721_vm5, %v932_v4, -inf }
 0x41d   : > { %939 = vmax.xlane.f32.xlu0 %v938_v6  ;;  %v935_v7 = vpop.f32.mrb[10].mxu1 }
 0x41e   : > { %v1480_v8 = vpop.f32.mrb[11].mxu1 }
 0x423   : > { %v1040_v9 = vpop.f32.mrb[12].mxu1 }
 0x424   : > { %v1491_v10 = vpop.f32.mrb[13].mxu1  ;;  %v1046_v11 = vsel %vm721_vm5, %v1040_v9, -inf }
 0x425   : > { %1047 = vmax.xlane.f32.xlu0 %v1046_v11  ;;  %v1043_v12 = vpop.f32.mrb[14].mxu1 }
 0x426   : > { %v1492_v13 = vpop.f32.mrb[15].mxu1  ;;  %840 = vrot.lane.b32.xlu1 %v673_v62, %s2000_s10  ;;  %s1194_s10 = sshll.u32 %s2427_s9, 4  ;;  %s2526_s10 = int_to_ptr.vmem [resolvable:$true] %s1194_s10 }
 0x42a   : > { %1056 = vrot.lane.b32.xlu1 %v673_v62, %s2002_s1  ;;  %s1179_s1 = scalar_lea.sflag [#allocation6], %s2397_s26 }
 0x430   : > { %v724_v14 = vpop.xlane.xlu0 %723 }
 0x431   : > { %v725_v15 = vsub.f32 %v715_v57, %v724_v14 }
 0x433   : > { %v726_v16 = vmul.f32 1.442695, %v725_v15 }
 0x435   : > { %1662 = vpow2.f32 %v726_v16 }
 0x43b   : > { %948 = vrot.lane.b32.xlu0 %v673_v62, %s2001_s22 }
 0x43f   : > { %v1663_v17 = vpop.eup %1662 }
 0x440   : > { %v731_v18 = vpack.c.bf16 %v1663_v17, %v1663_v17  ;;  %v728_v33 = vsel %vm721_vm5, %v1663_v17, 0.0 }
 0x442   : > { %1460 = vmatmul.mubr.msk.bf16.vlgmr.msra.gmra.mrb[4].mxu0 %vm721_vm5, %v731_v18  ;;  %v1390_v18 = vld [vmem:[%s2691_s23] ss:$0 sm:$0xff] }
 0x443   : > { %1471 = vmatprep.mubr.msk.bf16.mxu0 %vm1999_vm2, %v1998_v36 }
 0x4a2   : > { %v831_v19 = vpop.xlane.xlu1 %830 }
 0x4a3   : > { %v832_v20 = vsub.f32 %v823_v63, %v831_v19 }
 0x4a5   : > { %v833_v21 = vmul.f32 1.442695, %v832_v20 }
 0x4a6   : > { %v841_v22 = vpop.permute.xlu1 %840 }
 0x4a7   : > { %1664 = vpow2.f32 %v833_v21  ;;  %1470 = vmatpush3.bf16.msra.mxu0 %v841_v22 }
 0x4a8   : > { %1481 = vmatprep.subr.bf16.mxu0 %v1998_v36 }
 0x4aa   : > { %v940_v23 = vpop.xlane.xlu0 %939  ;;  %v1057_v38 = vpop.permute.xlu1 %1056 }
 0x4ab   : > { %v941_v24 = vsub.f32 %v932_v4, %v940_v23 }
 0x4ad   : > { %v942_v25 = vmul.f32 1.442695, %v941_v24 }
 0x4af   : > { %1666 = vpow2.f32 %v942_v25 }
 0x4b1   : > { %v1665_v26 = vpop.eup %1664 }
 0x4b2   : > { %v1048_v27 = vpop.xlane.xlu0 %1047  ;;  %v835_v28 = vsel %vm721_vm5, %v1665_v26, 0.0  ;;  %v838_v29 = vpack.c.bf16 %v1665_v26, %v1665_v26 }
 0x4b3   : > { %v1049_v30 = vsub.f32 %v1040_v9, %v1048_v27  ;;  %836 = vadd.xlane.f32.xlu1 %v835_v28 }
 0x4b4   : > { %1472 = vmatmul.mubr.msk.bf16.vlgmr.msra.gmra.mrb[8].mxu0 %vm721_vm5, %v838_v29 }
 0x4b5   : > { %v1050_v31 = vmul.f32 1.442695, %v1049_v30  ;;  %1483 = vmatprep.mubr.msk.bf16.mxu0 %vm1999_vm2, %v1998_v36 }
 0x4b6   : > { %v949_v32 = vpop.permute.xlu0 %948 }
 0x4b7   : > { %1668 = vpow2.f32 %v1050_v31  ;;  %729 = vadd.xlane.f32.xlu1 %v728_v33  ;;  %1482 = vmatpush3.bf16.msra.mxu0 %v949_v32 }
 0x4b8   : > { %1493 = vmatprep.subr.bf16.mxu0 %v1998_v36 }
 0x4b9   : > { %v1667_v34 = vpop.eup %1666 }
 0x4ba   : > { %v944_v35 = vsel %vm721_vm5, %v1667_v34, 0.0  ;;  %v947_v37 = vpack.c.bf16 %v1667_v34, %v1667_v34 }
 0x4bb   : > { %945 = vadd.xlane.f32.xlu0 %v944_v35 }
 0x4bc   : > { %1484 = vmatmul.mubr.msk.bf16.vlgmr.msra.gmra.mrb[12].mxu0 %vm721_vm5, %v947_v37 }
 0x4bd   : > { %1494 = vmatpush3.bf16.msra.mxu0 %v1057_v38  ;;  %1495 = vmatprep.mubr.msk.bf16.mxu0 %vm1999_vm2, %v1998_v36 }
 0x4c1   : > { %v1669_v39 = vpop.eup %1668 }
 0x4c2   : > { %v1052_v40 = vsel %vm721_vm5, %v1669_v39, 0.0  ;;  %v1055_v41 = vpack.c.bf16 %v1669_v39, %v1669_v39 }
 0x4c3   : > { %1053 = vadd.xlane.f32.xlu0 %v1052_v40 }
 0x4c4   : > { %1496 = vmatmul.mubr.msk.bf16.vlgmr.msra.gmra.mrb[16].mxu0 %vm721_vm5, %v1055_v41 }
 0x515   : > { %v769_v42 = vpop.f32.mrb[4].mxu0 }
 0x516   : > { %v1461_v43 = vpop.f32.mrb[5].mxu0 }
 0x517   : > { %v772_v44 = vpop.f32.mrb[6].mxu0 }
 0x518   : > { %v1462_v45 = vpop.f32.mrb[7].mxu0 }
 0x540   : > { %v837_v46 = vpop.xlane.xlu1 %836 }
 0x541   : > { %1670 = vrcp.f32 %v837_v46 }
 0x544   : > { %v730_v8 = vpop.xlane.xlu1 %729 }
 0x548   : > { %v946_v47 = vpop.xlane.xlu0 %945 }
 0x549   : > { %1672 = vrcp.f32 %v946_v47 }
 0x54b   : > { %v1671_v51 = vpop.eup %1670 }
 0x550   : > { %v1054_v56 = vpop.xlane.xlu0 %1053 }
 0x551   : > { %1674 = vrcp.f32 %v1054_v56 }
 0x552   : > { %1676 = vrcp.f32 %v730_v8 }
 0x553   : > { %v1673_v61 = vpop.eup %1672 }
 0x55b   : > { %v1675_v3 = vpop.eup %1674 }
 0x55c   : > { %v1677_v9 = vpop.eup %1676 }
 0x55d   : > { %v776_v12 = vmul.f32 %v1677_v9, %v769_v42 }
 0x587   : > { %v880_v52 = vpop.f32.mrb[8].mxu0 }
 0x588   : > { %v887_v53 = vmul.f32 %v1671_v51, %v880_v52  ;;  %v1473_v54 = vpop.f32.mrb[9].mxu0 }
 0x589   : > { %v883_v55 = vpop.f32.mrb[10].mxu0 }
 0x58a   : > { %1105 = vrot.lane.b32.xlu0 %v887_v53, %s2003_s7  ;;  %v1474_v57 = vpop.f32.mrb[11].mxu0  ;;  %s1852_s7 = scalar_lea.vmem %s2526_s10, 128 }
 0x58b   : > { %p1853_p13 = scmp.ne.s32.totalorder %s2526_s10, %s1852_s7 }
 0x58d   : > { %p1854_p1 = pnand %p1853_p13, %p2693_p3 }
 0x58f   : > { %v988_v62 = vpop.f32.mrb[12].mxu0  ;;  %p1855_p2 = pneg %p1854_p1 }
 0x590   : > { %v995_v63 = vmul.f32 %v1673_v61, %v988_v62  ;;  %v1485_v0 = vpop.f32.mrb[13].mxu0 }
 0x591   : > { %v991_v1 = vpop.f32.mrb[14].mxu0 }
 0x592   : > { %1109 = vrot.lane.b32.xlu1 %v995_v63, %s2004_s3  ;;  %v1486_v2 = vpop.f32.mrb[15].mxu0  ;;  %s2006_s3 = smov [#allocation15]  }
 0x597   : > { %v1096_v4 = vpop.f32.mrb[16].mxu0 }
 0x598   : > { %v1103_v36 = vmul.f32 %v1675_v3, %v1096_v4  ;;  %v1497_v5 = vpop.f32.mrb[17].mxu0 }
 0x599   : > { %v1099_v6 = vpop.f32.mrb[18].mxu0 }
 0x59a   : > { %1113 = vrot.lane.b32.xlu1 %v1103_v36, %s2005_s4  ;;  %v1498_v7 = vpop.f32.mrb[19].mxu0  ;;  %s1856_s4 = sshll.u32 %s2006_s3, 4  ;;  %s1857_s4 = int_to_ptr.vmem [resolvable:$false] %s1856_s4 }
 0x59b   : > { %s1858_s6 = scalar_lea.vmem %s1857_s4, 256  ;;  %p1859_p6 = scmp.lt.s32.totalorder %s2526_s10, %s1857_s4 }
 0x59c   : > { %p1860_p10 = scmp.lt.s32.totalorder %s1858_s6, %s1852_s7 }
 0x59e   : > { %p1861_p8 = por %p1860_p10, %p1859_p6 }
 0x5a0   : > { %p1862_p5 = pnand %p1861_p8, %p1855_p2 }
 0x5fc   : > { %v1106_v10 = vpop.permute.xlu0 %1105 }
 0x5fd   : > { %v1116_v13 = vsel %vm674_vm4, %v776_v12, %v1106_v10 }
 0x604   : > { %v1110_v11 = vpop.permute.xlu1 %1109 }
 0x605   : > { %v1117_v14 = vsel %vm721_vm5, %v1116_v13, %v1110_v11 }
 0x60c   : > { %v1114_v15 = vpop.permute.xlu1 %1113 }
 0x60d   : > { %v1119_v16 = vsel %vm1118_vm6, %v1117_v14, %v1114_v15 }
 0x60e   : > { %v1120_v17 = vpack.c.bf16 %v1119_v16, %v1119_v16 }
 0x610   : > { %1504 = vmatmul.mubr.msk.bf16.vlgmr.msra.gmra.mrb[16].mxu1 %vm626_vm3, %v1120_v17 }
 0x6e3   : > { %v1171_v19 = vpop.f32.mrb[16].mxu1 }
 0x6e4   : > { %v1172_v20 = vadd.f32 %v1390_v18, %v1171_v19  ;;  %v1505_v21 = vpop.f32.mrb[17].mxu1 }
 0x6e5   : > { %v1174_v22 = vpop.f32.mrb[18].mxu1 }
 0x6e6   : > { %1177 = vst.msk [vmem:[%s2427_s9] sm:$0xff] %vm626_vm3, %v1172_v20  ;;  %v1506_v23 = vpop.f32.mrb[19].mxu1 }
 0x6e7   : > { %1865 = shalt.err (!%p1862_p5)
}
 0x6e8   : > { %s1866_s26 = scalar_lea.hbm %s2524_s18, 128  ;;  %s1870_s16 = scalar_lea.hbm %s2692_s20, 512 }
 0x6e9   : > { %p1867_p7 = scmp.ne.s32.totalorder %s2524_s18, %s1866_s26  ;;  %p1871_p4 = scmp.lt.u32.totalorder %s2524_s18, %s2692_s20 }
 0x6ea   : > { %p1872_p0 = scmp.lt.u32.totalorder %s1870_s16, %s1866_s26  ;;  %p1874_p13 = scmp.lt.u32.totalorder %s1866_s26, %s2524_s18 }
 0x6eb   : > { %p1868_p12 = pnand %p1867_p7, %p2693_p3 }
 0x6ec   : > { %p1873_p11 = por %p1872_p0, %p1871_p4 }
 0x6ed   : > { %p1869_p9 = pneg %p1868_p12 }
 0x6ee   : > { %p1875_p1 = por %p1874_p13, %p1873_p11 }
 0x6f0   : > { %p1876_p2 = pnand %p1875_p1, %p1869_p9 }
 0x6f2   : > { %1879 = shalt.err (!%p1876_p2)
}
 0x6f3   : > { %1525 = dma.vmem_to_hbm [thread:$0]  (%p2693_p3), %s2526_s10, 128, %s2524_s18, %s1179_s1  }
 0x6f4 PF: > { %p1558_p6 = scmp.ge.s32.totalorder %s1986_s19, 2  ;;  %s1206_s27 = sand.u32 1, %s1958_s12  }
 0x6f5   : > { %p2694_p10 = scmp.ne.s32.totalorder %s2666_s24, 0  ;;  %s1207_s23 = scalar_lea.sflag [#allocation6], %s1206_s27 }
 0x6f7   : > { %p1548_p8 = pnand %p1558_p6, %p2694_p10 }
 0x6f9   : > { %1941 = dma.done.wait (!%p1548_p8), %s1207_s23, 128  }
 0x6fa   : > { %1943 = vsyncadd (!%p1548_p8), %s1207_s23, 4294967168  ;;  %s30_s19 = sadd.s32 1, %s1986_s19   ;;  %s2695_s30 = sld [smem:[#allocation21_spill]] }
 0x6fb   : > { %p27_p5 = scmp.ge.s32.totalorder %s30_s19, 6   ;;  %s2696_s16 = sld [smem:[#allocation24_spill]] }
 0x6fc   : > { %s2697_s28 = sld [smem:[#allocation29_spill]]  ;;  %s2698_s18 = sld [smem:[#allocation30_spill]] }
 0x6fd   : > { %s2699_s10 = smov %s1954_s11  ;;  %s2700_s11 = smov %s2312_s21 }
 0x6fe   : > { %s2701_s12 = smov %s1962_s13  ;;  %s2702_s13 = smov %s1966_s14 }
 0x6ff   : > { %s2703_s14 = smov %s2315_s15  ;;  %s2704_s15 = smov %s1978_s17 }
 0x700   :  { %29 = sbr.rel (!%p27_p5) target bundleno = 23 (0x17), region = 141 }
 0x702   : > { %s2705_s17 = smov %s2697_s28 }
 0x707   :  { %1212 = vsyncpa [#allocation5], 1 }
 0x708   :  { %1214 = vsyncpa [#allocation5 + $0x1], 1 }
 0x709   :  { %1215 = vsyncpa [#allocation8], 1 }
 0x70a   :  { %1217 = vsyncpa [#allocation8 + $0x1], 1 }
 0x70b   :  { %1218 = vsyncpa [#allocation11], 1 }
 0x70c   :  { %1219 = vsyncpa [#allocation14], 1 }
 0x70d   :  { %1220 = vsyncpa [#allocation6], 1 }
 0x70e   :  { %1222 = vsyncpa [#allocation6 + $0x1], 1 }

</bundles_post_ra>
